<compile_context>
chip_gen: v7x
topology: tpu7x:2x2x1
jax: 0.10.0
libtpu: 0.0.40
codegen_flags: <defaults>
</compile_context>

<pallas_src>
import jax
import jax.numpy as jnp
from jax.experimental import pallas as pl
from jax.experimental.pallas import tpu as pltpu


_VMEM_LIMIT_BYTES = 32 * 1024 * 1024   # explicit: > v5e 16 MiB default, <= v7x scoped
_BLOCK_BUDGET_BYTES = 4 * 1024 * 1024  # per-input block; total footprint ~= 4x this


def _divisors(n):
    return [d for d in range(1, n + 1) if n % d == 0]


def _sublane_multiple(dtype):
    # Required second-to-minor multiple for packed tiles by element width.
    return {1: 32, 2: 16, 4: 8}.get(jnp.dtype(dtype).itemsize, 8)


def _pick_blocks_lane_dense(N, S, max_itemsize, sub):
    """Pick (Bn, T): batch block and lane-dense spatial tile for (N, S) operands."""
    budget_elems = max(128, _BLOCK_BUDGET_BYTES // max_itemsize)
    # Batch block must be a multiple of the dtype sublane tile, or the full N.
    bn_cands = [d for d in _divisors(N) if d % sub == 0 or d == N]
    fit = [d for d in bn_cands if d * 128 <= budget_elems]
    Bn = max(fit) if fit else min(bn_cands)
    # Spatial tile: multiple of 128 dividing S, as large as the budget allows.
    t_cands = [t for t in _divisors(S) if t % 128 == 0]
    fit_t = [t for t in t_cands if Bn * t <= budget_elems]
    T = max(fit_t) if fit_t else min(t_cands)
    return Bn, T


def _split_parallel(NB, NS):
    """Split NS spatial tiles into (outer parallel, inner arbitrary) so the
    parallel grid axes carry >= 2 work units when NB == 1 (v7x megacore)."""
    if NB >= 2 or NS <= 1:
        return 1, NS
    for so in range(2, NS + 1):
        if NS % so == 0:
            return so, NS // so
    return 1, NS


def _mask_loss_kernel(pred_ref, gt_ref, out_ref, acc_ref):
    si = pl.program_id(2)

    @pl.when(si == 0)
    def _():
        acc_ref[...] = jnp.zeros(acc_ref.shape, acc_ref.dtype)

    x = pred_ref[...].astype(jnp.float32)
    g = gt_ref[...].astype(jnp.float32)
    d = jnp.abs(jax.nn.sigmoid(x) - g)
    # Fold all leading (sublane/batch) axes into a (1, lanes) row; the
    # cross-sublane reduce rides the XLU slot which is idle in this
    # bandwidth-bound kernel, and keeps the accumulator tiny.
    acc_ref[...] += jnp.sum(d, axis=tuple(range(d.ndim - 1)))[None, :]

    @pl.when(si == pl.num_programs(2) - 1)
    def _():
        total = jnp.sum(acc_ref[...])  # single lane reduce per partial tile
        out_ref[...] = jnp.full(out_ref.shape, total, out_ref.dtype)


def mask_loss_pallas(pred_mask, groundtruth_mask):
    """L1(mean) between sigmoid(pred_mask[:, 0]) and groundtruth_mask."""
    N, C, H, W = pred_mask.shape
    assert groundtruth_mask.shape == (N, H, W)
    S = H * W
    count = float(N * S)

    gt = groundtruth_mask
    if gt.dtype == jnp.bool_:
        # Packed-bool DMA path is not lane-dense / well tested; bf16 halves
        # bytes vs f32 while staying layout-friendly.
        gt = gt.astype(jnp.bfloat16)

    itemsizes = (jnp.dtype(pred_mask.dtype).itemsize, jnp.dtype(gt.dtype).itemsize)
    sub = max(_sublane_multiple(pred_mask.dtype), _sublane_multiple(gt.dtype))
    lane_dense = (S % 128 == 0)

    if lane_dense:
        # Free metadata reshape on a row-major array; channel 0 of sample n
        # lives in columns [0, S) of row n, so only 1/C of pred is fetched.
        # TODO(synk): verify in HLO that no copy/transpose feeds the pallas_call
        # if pred_mask ever arrives with a non-default layout.
        pred = pred_mask.reshape(N, C * S)
        gt2 = gt.reshape(N, S)
        Bn, T = _pick_blocks_lane_dense(N, S, max(itemsizes), sub)
        NB, NS = N // Bn, S // T
        SO, SI = _split_parallel(NB, NS)
        grid = (NB, SO, SI)
        in_specs = [
            pl.BlockSpec((Bn, T), lambda b, so, si: (b, so * SI + si)),
            pl.BlockSpec((Bn, T), lambda b, so, si: (b, so * SI + si)),
        ]
        acc_lanes = T
        operands = (pred, gt2)
    else:
        # Fallback (H*W not a multiple of 128): keep pred 4-D and select
        # channel 0 with a squeezed channel dim in the index_map; full (H, W)
        # last dims satisfy the tiling rule, and no strided channel-0 copy is
        # materialized in the wrapper.
        budget_elems = max(1, _BLOCK_BUDGET_BYTES // max(itemsizes))
        bn_cands = [d for d in _divisors(N) if d * S <= budget_elems]
        Bn = max(bn_cands) if bn_cands else 1
        NB = N // Bn
        SO, SI = 1, 1
        grid = (NB, SO, SI)
        in_specs = [
            pl.BlockSpec((Bn, pl.Squeezed(), H, W), lambda b, so, si: (b, 0, 0, 0)),
            pl.BlockSpec((Bn, H, W), lambda b, so, si: (b, 0, 0)),
        ]
        acc_lanes = W
        operands = (pred_mask, gt)

    cost = pl.CostEstimate(
        flops=6 * N * S,
        transcendentals=N * S,
        bytes_accessed=(N * S * (itemsizes[0] + itemsizes[1])
                        + NB * SO * 8 * 128 * 4),
    )

    partials = pl.pallas_call(
        _mask_loss_kernel,
        out_shape=jax.ShapeDtypeStruct((NB, SO, 8, 128), jnp.float32),
        grid_spec=pltpu.PrefetchScalarGridSpec(
            num_scalar_prefetch=0,
            grid=grid,
            in_specs=in_specs,
            # One lane-dense (8,128) partial-sum tile per (batch block, outer
            # spatial block) so both parallel axes are megacore-safe.
            out_specs=pl.BlockSpec((1, 1, 8, 128), lambda b, so, si: (b, so, 0, 0)),
            scratch_shapes=[pltpu.VMEM((1, acc_lanes), jnp.float32)],
        ),
        compiler_params=pltpu.CompilerParams(
            dimension_semantics=("parallel", "parallel", "arbitrary"),
            vmem_limit_bytes=_VMEM_LIMIT_BYTES,
        ),
        cost_estimate=cost,
    )(*operands)

    # Every element of each partial tile holds that block's sum.
    return jnp.sum(partials[:, :, 0, 0]) / count


def mask_loss_ref(pred_mask, groundtruth_mask):
    """Pure-JAX reference matching the PyTorch module."""
    p = jax.nn.sigmoid(pred_mask[:, 0, :, :].astype(jnp.float32))
    return jnp.mean(jnp.abs(p - groundtruth_mask.astype(jnp.float32)))


if __name__ == "__main__":
    key = jax.random.PRNGKey(0)
    k1, k2 = jax.random.split(key)

    N, C, H, W = 2, 4, 16, 16
    pred_mask = jax.random.normal(k1, (N, C, H, W), dtype=jnp.float32)
    # Ground-truth mask in {0, 1}, shape [N, H, W].
    groundtruth_mask = (
        jax.random.uniform(k2, (N, H, W), dtype=jnp.float32) > 0.5
    ).astype(jnp.float32)

    loss = jax.block_until_ready(mask_loss_pallas(pred_mask, groundtruth_mask))
    ref = jax.block_until_ready(mask_loss_ref(pred_mask, groundtruth_mask))

    assert jnp.allclose(loss, ref, atol=1e-5, rtol=1e-5), (loss, ref)
    print("KERNEL_OK")
</pallas_src>

<mosaic_0001>
module attributes {stable_mosaic.version = 11 : i64} {
  func.func @_mask_loss_kernel(%arg0: i32, %arg1: i32, %arg2: i32, %arg3: memref<2x256xf32, #tpu.memory_space<vmem>>, %arg4: memref<2x256xf32, #tpu.memory_space<vmem>>, %arg5: memref<1x1x8x128xf32, #tpu.memory_space<vmem>>, %arg6: memref<1x256xf32, #tpu.memory_space<vmem>>) attributes {dimension_semantics = [#tpu.dimension_semantics<parallel>, #tpu.dimension_semantics<parallel>, #tpu.dimension_semantics<arbitrary>], iteration_bounds = array<i64: 1, 1, 1>, scalar_prefetch = 0 : i64, scratch_operands = 1 : i64, tpu.core_type = #tpu.core_type<tc>, window_params = [{transform_indices = @transform_0, window_bounds = array<i64: 2, 256>}, {transform_indices = @transform_1, window_bounds = array<i64: 2, 256>}, {transform_indices = @transform_2, window_bounds = array<i64: 1, 1, 8, 128>}]} {
    %c0_i32 = arith.constant 0 : i32
    %0 = arith.cmpi eq, %arg2, %c0_i32 : i32
    %1 = arith.extui %0 : i1 to i32
    %c0_i32_0 = arith.constant 0 : i32
    %2 = arith.cmpi ne, %1, %c0_i32_0 : i32
    scf.if %2 {
      %cst_11 = arith.constant 0.000000e+00 : f32
      %20 = vector.broadcast %cst_11 : f32 to vector<1x256xf32>
      %c0_12 = arith.constant 0 : index
      %c0_13 = arith.constant 0 : index
      %21 = vector.load %arg6[%c0_12, %c0_13] : memref<1x256xf32, #tpu.memory_space<vmem>>, vector<1x256xf32>
      tpu.vector_store %arg6[%c0_12, %c0_13], %20 {strides = array<i32>} : memref<1x256xf32, #tpu.memory_space<vmem>>, vector<1x256xf32>,
    } else {
    }
    %c0 = arith.constant 0 : index
    %c0_1 = arith.constant 0 : index
    %3 = vector.load %arg3[%c0, %c0_1] : memref<2x256xf32, #tpu.memory_space<vmem>>, vector<2x256xf32>
    %c0_2 = arith.constant 0 : index
    %c0_3 = arith.constant 0 : index
    %4 = vector.load %arg4[%c0_2, %c0_3] : memref<2x256xf32, #tpu.memory_space<vmem>>, vector<2x256xf32>
    %5 = arith.negf %3 : vector<2x256xf32>
    %6 = math.exp %5 : vector<2x256xf32>
    %cst = arith.constant 1.000000e+00 : f32
    %7 = vector.broadcast %cst : f32 to vector<2x256xf32>
    %8 = arith.addf %7, %6 : vector<2x256xf32>
    %9 = arith.divf %7, %8 : vector<2x256xf32>
    %10 = arith.subf %9, %4 : vector<2x256xf32>
    %11 = math.absf %10 : vector<2x256xf32>
    %c0_4 = arith.constant 0 : index
    %c0_5 = arith.constant 0 : index
    %12 = vector.load %arg6[%c0_4, %c0_5] : memref<1x256xf32, #tpu.memory_space<vmem>>, vector<1x256xf32>
    %cst_6 = arith.constant dense<0.000000e+00> : vector<256xf32>
    %13 = vector.multi_reduction <add>, %11, %cst_6 [0] : vector<2x256xf32> to vector<256xf32>
    %14 = vector.shape_cast %13 : vector<256xf32> to vector<1x256xf32>
    %15 = arith.addf %12, %14 : vector<1x256xf32>
    %c0_7 = arith.constant 0 : index
    %c0_8 = arith.constant 0 : index
    %16 = vector.load %arg6[%c0_7, %c0_8] : memref<1x256xf32, #tpu.memory_space<vmem>>, vector<1x256xf32>
    tpu.vector_store %arg6[%c0_7, %c0_8], %15 {strides = array<i32>} : memref<1x256xf32, #tpu.memory_space<vmem>>, vector<1x256xf32>,
    %c0_i32_9 = arith.constant 0 : i32
    %17 = arith.cmpi eq, %arg2, %c0_i32_9 : i32
    %18 = arith.extui %17 : i1 to i32
    %c0_i32_10 = arith.constant 0 : i32
    %19 = arith.cmpi ne, %18, %c0_i32_10 : i32
    scf.if %19 {
      %c0_11 = arith.constant 0 : index
      %c0_12 = arith.constant 0 : index
      %20 = vector.load %arg6[%c0_11, %c0_12] : memref<1x256xf32, #tpu.memory_space<vmem>>, vector<1x256xf32>
      %21 = vector.shape_cast %20 : vector<1x256xf32> to vector<1x1x256xf32>
      %cst_13 = arith.constant dense<0.000000e+00> : vector<1xf32>
      %22 = vector.multi_reduction <add>, %21, %cst_13 [1, 2] : vector<1x1x256xf32> to vector<1xf32>
      %23 = vector.shape_cast %22 : vector<1xf32> to vector<1x1x1xf32>
      %24 = vector.extract %23[0, 0, 0] : f32 from vector<1x1x1xf32>
      %25 = vector.broadcast %24 : f32 to vector<1x1x8x128xf32>
      %c0_14 = arith.constant 0 : index
      %c0_15 = arith.constant 0 : index
      %c0_16 = arith.constant 0 : index
      %c0_17 = arith.constant 0 : index
      %26 = vector.load %arg5[%c0_14, %c0_15, %c0_16, %c0_17] : memref<1x1x8x128xf32, #tpu.memory_space<vmem>>, vector<1x1x8x128xf32>
      tpu.vector_store %arg5[%c0_14, %c0_15, %c0_16, %c0_17], %25 {strides = array<i32>} : memref<1x1x8x128xf32, #tpu.memory_space<vmem>>, vector<1x1x8x128xf32>,
    } else {
    }
    return
  }
  func.func @transform_0(%arg0: i32, %arg1: i32, %arg2: i32) -> (i32, i32) {
    %c1_i32 = arith.constant 1 : i32
    %0 = arith.muli %arg1, %c1_i32 : i32
    %1 = arith.addi %0, %arg2 : i32
    %c0_i32 = arith.constant 0 : i32
    return %arg0, %1 : i32, i32
  }
  func.func @transform_1(%arg0: i32, %arg1: i32, %arg2: i32) -> (i32, i32) {
    %c1_i32 = arith.constant 1 : i32
    %0 = arith.muli %arg1, %c1_i32 : i32
    %1 = arith.addi %0, %arg2 : i32
    %c0_i32 = arith.constant 0 : i32
    return %arg0, %1 : i32, i32
  }
  func.func @transform_2(%arg0: i32, %arg1: i32, %arg2: i32) -> (i32, i32, i32, i32) {
    %c0_i32 = arith.constant 0 : i32
    %c0_i32_0 = arith.constant 0 : i32
    %c0_i32_1 = arith.constant 0 : i32
    return %arg0, %arg1, %c0_i32, %c0_i32_0 : i32, i32, i32, i32
  }
}

</mosaic_0001>

<bundles_post_ra>
// kernel: tpu_custom_call.1
= control target key start
LH: loop header
LB: loop body
LE: loop exit
PB: predicated region body
PF: predicated region fallthrough
CT: control target
= control target key end

     0   :  { %7 = vsyncpa [#allocation4], 0  ;;  %s324_s0 = inlined_call_operand.hbm [shape: f32[2,1024], index: 0, kind: input, shape index: {}]   ;;  %s325_s1 = inlined_call_operand.hbm [shape: f32[2,256], index: 1, kind: input, shape index: {}]   ;;  %s326_s2 = inlined_call_operand.hbm [shape: f32[1,1,8,128], index: 2, kind: output, shape index: {}]  }
   0x1   :  { %8 = vsyncpa [#allocation7], 0 }
   0x2   :  { %9 = vsyncpa [#allocation5], 0  ;;  %s249_s9 = smov [#allocation3]   ;;  %s250_s11 = smov [#allocation6]  }
   0x3   :  { %s20_s10 = sshll.u32 %s249_s9, 4  ;;  %s34_s12 = sshll.u32 %s250_s11, 4  ;;  %s21_s10 = int_to_ptr.vmem [resolvable:$true] %s20_s10  ;;  %s270_s12 = int_to_ptr.vmem [resolvable:$true] %s34_s12 }
   0x4   :  { %s177_s15 = scalar_lea.hbm %s324_s0, 64  ;;  %s179_s20 = scalar_lea.hbm %s324_s0, 256 }
   0x5   :  { %p178_p0 = scmp.ne.s32.totalorder %s324_s0, %s177_s15  ;;  %p180_p1 = scmp.lt.u32.totalorder %s179_s20, %s177_s15 }
   0x6   :  { %p181_p2 = scmp.lt.u32.totalorder %s177_s15, %s324_s0 }
   0x8   :  { %p182_p3 = por %p181_p2, %p180_p1 }
   0xa   :  { %p183_p4 = pnand %p182_p3, %p178_p0 }
   0xc   :  { %186 = shalt.err (!%p183_p4)
}
   0xd   :  { %s187_s23 = scalar_lea.vmem %s21_s10, 64  ;;  %p192_p6 = scmp.lt.s32.totalorder %s21_s10, %s21_s10 }
   0xe   :  { %p188_p5 = scmp.ne.s32.totalorder %s21_s10, %s187_s23  ;;  %p193_p7 = scmp.lt.s32.totalorder %s187_s23, %s187_s23 }
  0x10   :  { %p194_p8 = por %p193_p7, %p192_p6 }
  0x12   :  { %p195_p9 = pnand %p194_p8, %p188_p5 }
  0x14   :  { %198 = shalt.err (!%p195_p9)
}
  0x15   :  { %23 = dma.hbm_to_vmem [thread:$0]  %s324_s0, 64, %s21_s10, [#allocation4]  }
  0x16   :  { %s199_s28 = scalar_lea.hbm %s325_s1, 64 }
  0x17   :  { %p200_p10 = scmp.ne.s32.totalorder %s325_s1, %s199_s28  ;;  %p203_p11 = scmp.lt.u32.totalorder %s199_s28, %s325_s1 }
  0x19   :  { %p205_p12 = pnand %p203_p11, %p200_p10 }
  0x1b   :  { %208 = shalt.err (!%p205_p12)
}
  0x1c   :  { %s209_s5 = scalar_lea.vmem %s270_s12, 64  ;;  %p214_p0 = scmp.lt.s32.totalorder %s270_s12, %s270_s12 }
  0x1d   :  { %p210_p13 = scmp.ne.s32.totalorder %s270_s12, %s209_s5  ;;  %p215_p1 = scmp.lt.s32.totalorder %s209_s5, %s209_s5 }
  0x1f   :  { %p216_p2 = por %p215_p1, %p214_p0 }
  0x21   :  { %p217_p3 = pnand %p216_p2, %p210_p13 }
  0x23   :  { %220 = shalt.err (!%p217_p3)
}
  0x24   :  { %37 = dma.hbm_to_vmem [thread:$0]  %s325_s1, 64, %s270_s12, [#allocation7]  }
  0x25   :  { %243 = dma.done.wait [#allocation4], 64  }
  0x26   :  { %244 = vsyncadd [#allocation4], 4294967232 }
  0x27   :  { %245 = dma.done.wait [#allocation7], 64  }
  0x28   :  { %246 = vsyncadd [#allocation7], 4294967232  ;;  %v52_v0 = vlaneseq  ;;  %v251_v2 = vmov 0.0   ;;  %v57_v3 = vld [vmem:[#allocation3] sm:$0xf]  ;;  %vm79_vm1 = vcmask 1041408  }
  0x29   :  { %v164_v4 = vmul.f32 -1.442695, %v57_v3  ;;  %v252_v7 = vmov 1983009808   ;;  %v58_v11 = vld [vmem:[#allocation6] sm:$0xf] }
  0x2a   :  { %vm304_vm0 = vcmp.lt.s32.totalorder %v52_v0, 256  ;;  %v70_v8 = vunpack.c.l.s4 %v252_v7  ;;  %v73_v10 = vshrl.u32 %v52_v0, 7  ;;  %v253_v25 = vmov 1966171168   ;;  %s254_s1 = smov [#allocation8]  }
  0x2b   :  { %56 = vst.msk [vmem:[#allocation2] sm:$0x3] %vm304_vm0, %v251_v2  ;;  %173 = vpow2.f32 %v164_v4  ;;  %v98_v26 = vunpack.c.l.s4 %v253_v25  ;;  %vm133_vm2 = vcmask 1040384   ;;  %s154_s7 = sshll.u32 %s254_s1, 4  ;;  %s155_s7 = int_to_ptr.vmem [resolvable:$true] %s154_s7 }
  0x2c   :  { %v71_v9 = vunpack.c.0.s8 %v70_v8  ;;  %v125_v41 = vsub.s32 0, %v73_v10  ;;  %v129_v42 = vsub.s32 1, %v73_v10  ;;  %s221_s9 = scalar_lea.vmem %s155_s7, 128  ;;  %p226_p5 = scmp.lt.s32.totalorder %s155_s7, %s155_s7 }
  0x2d   :  { %v99_v31 = vunpack.c.0.s8 %v98_v26  ;;  %p222_p4 = scmp.ne.s32.totalorder %s155_s7, %s221_s9  ;;  %p227_p6 = scmp.lt.s32.totalorder %s221_s9, %s221_s9 }
  0x2e   :  { %v74_v14 = vsub.s32 %v71_v9, %v73_v10 }
  0x2f   :  { %v102_v35 = vsub.s32 %v99_v31, %v73_v10  ;;  %p228_p7 = por %p227_p6, %p226_p5 }
  0x31   :  { %p229_p8 = pnand %p228_p7, %p222_p4 }
  0x32   :  { %v67_v38 = vld [vmem:[#allocation2] sm:$0x3] }
  0x35   :  { %v174_v5 = vpop.eup %173 }
  0x36   :  { %v62_v6 = vadd.f32 1.0, %v174_v5 }
  0x38   :  { %175 = vrcp.f32 %v62_v6 }
  0x42   :  { %v176_v12 = vpop.eup %175 }
  0x43   :  { %v65_v13 = vsub.f32 %v176_v12, %v58_v11 }
  0x45   :  { %v66_v15 = vand.u32 2147483647, %v65_v13 }
  0x47   :  { %v75_v16 = vrot.slane %v66_v15, %v74_v14 }
  0x49   :  { %v76_v17 = vcombine.high %v75_v16, %v75_v16  ;;  %v80_v18 = vsel %vm79_vm1, %v75_v16, 0.0 }
  0x4a   :  { %v81_v19 = vrot.slane %v80_v18, 4 }
  0x4b   :  { %v87_v20 = vsel %vm79_vm1, %v76_v17, 0.0 }
  0x4c   :  { %v82_v21 = vadd.f32 %v81_v19, %v80_v18  ;;  %v88_v22 = vrot.slane %v87_v20, 4 }
  0x4e   :  { %v83_v23 = vrot.slane %v82_v21, 2  ;;  %v89_v24 = vadd.f32 %v88_v22, %v87_v20 }
  0x50   :  { %v84_v27 = vadd.f32 %v83_v23, %v82_v21  ;;  %v90_v28 = vrot.slane %v89_v24, 2 }
  0x52   :  { %v85_v29 = vrot.slane %v84_v27, 1  ;;  %v91_v30 = vadd.f32 %v90_v28, %v89_v24 }
  0x54   :  { %v86_v32 = vadd.f32 %v85_v29, %v84_v27  ;;  %v92_v33 = vrot.slane %v91_v30, 1 }
  0x56   :  { %v93_v34 = vadd.f32 %v92_v33, %v91_v30 }
  0x58   :  { %v96_v36 = vcombine.low %v86_v32, %v93_v34 }
  0x5a   :  { %v103_v37 = vrot.slane %v96_v36, %v102_v35 }
  0x5c   :  { %v110_v39 = vrot.slane %v103_v37, %v102_v35 }
  0x5e   :  { %v112_v40 = vadd.f32 %v110_v39, %v67_v38 }
  0x60   :  { %117 = vst.msk [vmem:[#allocation2] sm:$0x3] %vm304_vm0, %v112_v40 }
  0x67   :  { %v121_v43 = vld [vmem:[#allocation2] sm:$0x3] }
  0x68   :  { %v126_v44 = vrot.slane %v121_v43, %v125_v41  ;;  %v130_v45 = vrot.slane %v121_v43, %v129_v42 }
  0x6a   :  { %v134_v46 = vsel %vm133_vm2, %v126_v44, 0.0  ;;  %v135_v47 = vsel %vm133_vm2, %v130_v45, 0.0 }
  0x6b   :  { %v136_v48 = vadd.f32 %v135_v47, %v134_v46 }
  0x6d   :  { %137 = vadd.xlane.f32.xlu0 %v136_v48 }
  0xfa   :  { %v138_v49 = vpop.xlane.xlu0 %137 }
  0xfb   :  { %v139_v50 = vrot.slane %v138_v49, 4 }
  0xfd   :  { %v140_v51 = vadd.f32 %v139_v50, %v138_v49 }
  0xff   :  { %v141_v52 = vrot.slane %v140_v51, 2 }
 0x101   :  { %v142_v53 = vadd.f32 %v141_v52, %v140_v51 }
 0x103   :  { %v143_v54 = vrot.slane %v142_v53, 1 }
 0x105   :  { %v144_v55 = vadd.f32 %v143_v54, %v142_v53 }
 0x107   :  { %165 = vpush %v144_v55 }
 0x138   :  { %s166_s8 = spop %165 }
 0x139   :  { %v146_v56 = vstv %s166_s8 }
 0x13a   :  { %147 = vst [vmem:[#allocation8] sm:$0xff] %v146_v56 }
 0x13b   :  { %232 = shalt.err (!%p229_p8)
}
 0x13c   :  { %s233_s12 = scalar_lea.hbm %s326_s2, 128 }
 0x13d   :  { %p234_p9 = scmp.ne.s32.totalorder %s326_s2, %s233_s12  ;;  %p237_p10 = scmp.lt.u32.totalorder %s233_s12, %s326_s2 }
 0x13f   :  { %p239_p11 = pnand %p237_p10, %p234_p9 }
 0x141   :  { %242 = shalt.err (!%p239_p11)
}
 0x142   :  { %157 = dma.vmem_to_hbm [thread:$0]  %s155_s7, 128, %s326_s2, [#allocation5]  }
 0x143   :  { %247 = dma.done.wait [#allocation5], 128  }
 0x144   :  { %248 = vsyncadd [#allocation5], 4294967168 }
 0x145   :  { %161 = vsyncpa [#allocation4], 1 }
 0x146   :  { %162 = vsyncpa [#allocation7], 1 }
 0x147   :  { %163 = vsyncpa [#allocation5], 1 }

</bundles_post_ra>
